<compile_context>
chip_gen: v6e
topology: v6e:2x2x1
jax: 0.10.0
libtpu: 0.0.40
codegen_flags: <defaults>
</compile_context>

<pallas_src>
import functools

import jax
import jax.numpy as jnp
import numpy as np
from jax.experimental import pallas as pl
from jax.experimental.pallas import tpu as pltpu


# ----------------------------------------------------------------------------
# helpers: tile sizing, VMEM budget
# ----------------------------------------------------------------------------
_ALIGN = 8  # sublane alignment for the second-to-last block dim


def _round_up(n, m):
    return ((n + m - 1) // m) * m


def _vmem_budget_bytes():
    """Generation-aware VMEM budget (v5e/v6e: 128 MiB, v7x: 64 MiB) w/ headroom."""
    try:
        cap = pltpu.get_tpu_info().vmem_capacity_bytes
    except Exception:
        cap = 64 * 1024 * 1024  # assume the smallest (v7x) if the query fails
    return int(cap * 3 // 4)    # leave headroom for Mosaic internals / params


def _choose_row_tile(M, D, *, n_live_blocks, itemsize=4, resident_bytes=0,
                     pref_rows=512, vmem_budget=None, mxu_align=None):
    """Row-tile size: big (HBM roofline), VMEM-safe (double-buffered
    n_live_blocks tiles of (tm, D) f32), >= 2 grid steps when possible so the
    'parallel' grid axis can shard across v7x's two TensorCores."""
    if vmem_budget is None:
        vmem_budget = _vmem_budget_bytes()
    budget = max(vmem_budget - resident_bytes,
                 _ALIGN * D * itemsize * n_live_blocks * 2)
    bytes_per_row = n_live_blocks * 2 * D * itemsize      # x2: double buffering
    cap_rows = max(_ALIGN, budget // bytes_per_row)
    tm = min(pref_rows, cap_rows, _round_up(M, _ALIGN))
    tm = max(_ALIGN, (tm // _ALIGN) * _ALIGN)
    # keep >= 2 grid steps when M spans more than one aligned tile (v7x megacore)
    if M > _ALIGN and -(-M // tm) < 2:
        tm = max(_ALIGN, _round_up(-(-M // 2), _ALIGN))
    # when the tile is large and feeds the MXU, align to 256 rows (v6e/v7x 256x256 MXU)
    if mxu_align and tm >= mxu_align:
        tm = (tm // mxu_align) * mxu_align
    return tm


# ----------------------------------------------------------------------------
# kernel 1: pre-LayerNorm (matches the custom PyTorch LayerNorm exactly)
# ----------------------------------------------------------------------------
def _layernorm_kernel(eps, x_ref, a_ref, b_ref, o_ref):
    x = x_ref[...].astype(jnp.float32)
    d = x.shape[-1]
    mean = jnp.mean(x, axis=-1, keepdims=True)
    xc = x - mean
    # torch.Tensor.std(-1) is UNBIASED (divide by D-1); eps is added to std.
    var = jnp.sum(xc * xc, axis=-1, keepdims=True) * (1.0 / (d - 1))
    inv = pl.reciprocal(jnp.sqrt(var) + eps, approx=False)   # (tm, 1) per-row scalar
    y = a_ref[...].astype(jnp.float32) * (xc * inv) + b_ref[...].astype(jnp.float32)
    o_ref[...] = y.astype(o_ref.dtype)


def layer_norm(x2d, a2, b2, *, eps=1e-6, out_dtype=None):
    """x2d: (M, D); a2, b2: (D,). LayerNorm with the module's exact semantics."""
    M, D = x2d.shape
    if out_dtype is None:
        out_dtype = x2d.dtype       # pass jnp.bfloat16 to halve HBM bytes if desired
    tm = _choose_row_tile(M, D, n_live_blocks=3)
    grid = (pl.cdiv(M, tm),)        # ragged last block is masked -> no pad/slice copies
    return pl.pallas_call(
        functools.partial(_layernorm_kernel, eps),
        out_shape=jax.ShapeDtypeStruct((M, D), out_dtype),
        grid_spec=pltpu.PrefetchScalarGridSpec(
            num_scalar_prefetch=0,
            grid=grid,
            in_specs=[
                pl.BlockSpec((tm, D), lambda i: (i, 0)),   # x row tile
                pl.BlockSpec((1, D), lambda i: (0, 0)),    # a_2 (resident)
                pl.BlockSpec((1, D), lambda i: (0, 0)),    # b_2 (resident)
            ],
            out_specs=pl.BlockSpec((tm, D), lambda i: (i, 0)),
        ),
        compiler_params=pltpu.CompilerParams(
            dimension_semantics=("parallel",),
            vmem_limit_bytes=_vmem_budget_bytes()),
    )(x2d, a2.reshape(1, D), b2.reshape(1, D))


# ----------------------------------------------------------------------------
# kernel 2 (fused path): LN -> position-wise Linear (bf16 MXU) -> bias -> residual
# ----------------------------------------------------------------------------
def _fused_ln_linear_residual_kernel(eps, x_ref, a_ref, b_ref, w_ref, wb_ref, o_ref):
    x = x_ref[...].astype(jnp.float32)                       # (tm, D)
    d = x.shape[-1]
    mean = jnp.mean(x, axis=-1, keepdims=True)
    xc = x - mean
    var = jnp.sum(xc * xc, axis=-1, keepdims=True) * (1.0 / (d - 1))
    inv = pl.reciprocal(jnp.sqrt(var) + eps, approx=True)    # (tm, 1), EUP slot
    y = a_ref[...].astype(jnp.float32) * (xc * inv) + b_ref[...].astype(jnp.float32)
    # bf16 inputs on the MXU, f32 accumulation.
    s = jnp.dot(y.astype(jnp.bfloat16), w_ref[...],
                preferred_element_type=jnp.float32)           # (tm, N)
    o_ref[...] = (x + s + wb_ref[...].astype(jnp.float32)).astype(o_ref.dtype)


def sublayer_connection_fused_linear(x, w, wb, a2, b2, *, eps=1e-6,
                                     dropout_rate=0.0, training=False):
    """Fused x + Linear(LayerNorm(x)) in ONE Pallas kernel.
    One HBM read of x, one write of out; W resident in VMEM as bf16.
    """
    if training and dropout_rate > 0.0:
        # TODO(synk): training-mode inverted-scale dropout via pltpu.prng_seed /
        # pltpu.prng_random_bits inside the fused kernel.
        raise NotImplementedError("training-mode dropout is not implemented")
    B, S, D = x.shape
    N = w.shape[1]
    assert N == D, "SublayerConnection requires a width-preserving sublayer"
    M = B * S
    x2d = x.reshape(M, D)
    w_bf = w.astype(jnp.bfloat16)                 # halves weight HBM bytes, MXU-native
    # TODO(synk): for very large D, tile W over K/N (and accumulate in the MRB on v7x)
    resident = D * N * 2 + 3 * D * 4              # W (bf16) + a_2/b_2/bias (f32)
    tm = _choose_row_tile(M, D, n_live_blocks=4,
                          resident_bytes=resident, mxu_align=256)
    grid = (pl.cdiv(M, tm),)
    out = pl.pallas_call(
        functools.partial(_fused_ln_linear_residual_kernel, eps),
        out_shape=jax.ShapeDtypeStruct((M, N), x.dtype),
        grid_spec=pltpu.PrefetchScalarGridSpec(
            num_scalar_prefetch=0,
            grid=grid,
            in_specs=[
                pl.BlockSpec((tm, D), lambda i: (i, 0)),   # x row tile
                pl.BlockSpec((1, D), lambda i: (0, 0)),    # a_2 (resident)
                pl.BlockSpec((1, D), lambda i: (0, 0)),    # b_2 (resident)
                pl.BlockSpec((D, N), lambda i: (0, 0)),    # W  (resident, bf16)
                pl.BlockSpec((1, N), lambda i: (0, 0)),    # bias (resident)
            ],
            out_specs=pl.BlockSpec((tm, N), lambda i: (i, 0)),
        ),
        compiler_params=pltpu.CompilerParams(
            dimension_semantics=("parallel",),
            vmem_limit_bytes=_vmem_budget_bytes()),
    )(x2d, a2.reshape(1, D), b2.reshape(1, D), w_bf, wb.reshape(1, N))
    return out.reshape(B, S, D)


# ----------------------------------------------------------------------------
# SublayerConnection forward (general sublayer): Pallas LN + plain-JAX rest
# ----------------------------------------------------------------------------
def sublayer_connection(x, sublayer_fn, a2, b2, *, eps=1e-6,
                        dropout_rate=0.0, training=False):
    """out = x + dropout(sublayer_fn(LayerNorm(x))); eval-mode dropout = identity."""
    if training and dropout_rate > 0.0:
        # TODO(synk): training-mode inverted-scale dropout (pltpu PRNG) not implemented.
        raise NotImplementedError("training-mode dropout is not implemented")
    B, S, D = x.shape
    x2d = x.reshape(B * S, D)
    y = layer_norm(x2d, a2, b2, eps=eps)                # Pallas LN kernel
    s = sublayer_fn(y.reshape(B, S, D))                 # arbitrary sublayer (plain JAX)
    return x + s                                        # residual add fused by XLA


# ----------------------------------------------------------------------------
# pure-JAX reference (same semantics as the PyTorch module in eval mode)
# ----------------------------------------------------------------------------
def reference(x, sublayer_fn, a2, b2, eps=1e-6):
    mean = jnp.mean(x, axis=-1, keepdims=True)
    xc = x - mean
    std = jnp.sqrt(jnp.sum(xc * xc, axis=-1, keepdims=True) / (x.shape[-1] - 1))
    y = a2 * xc / (std + eps) + b2
    return x + sublayer_fn(y)


if __name__ == "__main__":
    key = jax.random.PRNGKey(0)
    B, S, D = 2, 8, 128          # D=128 keeps the last dim lane-dense on TPU

    kx, ka, kb, kw, kwb = jax.random.split(key, 5)
    x = jax.random.normal(kx, (B, S, D), jnp.float32)
    a2 = 1.0 + 0.05 * jax.random.normal(ka, (D,), jnp.float32)   # LayerNorm a_2
    b2 = 0.05 * jax.random.normal(kb, (D,), jnp.float32)         # LayerNorm b_2

    # representative sublayer: position-wise linear
    w = jax.random.normal(kw, (D, D), jnp.float32) * (1.0 / np.sqrt(D))
    wb = 0.1 * jax.random.normal(kwb, (D,), jnp.float32)
    sublayer_fn = lambda y: y @ w + wb

    ref = reference(x, sublayer_fn, a2, b2)

    # ---- general path: Pallas LN kernel, sublayer + residual fused by XLA ----
    run_general = jax.jit(
        lambda x, a2, b2, w, wb: sublayer_connection(
            x, lambda y: y @ w + wb, a2, b2))
    out_general = jax.block_until_ready(run_general(x, a2, b2, w, wb))
    np.testing.assert_allclose(np.asarray(out_general), np.asarray(ref),
                               rtol=1e-5, atol=1e-5)

    # ---- fused path: single kernel (LN -> bf16 MXU matmul -> bias -> residual) ----
    run_fused = jax.jit(
        lambda x, w, wb, a2, b2: sublayer_connection_fused_linear(x, w, wb, a2, b2))
    out_fused = jax.block_until_ready(run_fused(x, w, wb, a2, b2))
    # bf16 matmul inputs -> looser tolerance vs. the f32 reference
    np.testing.assert_allclose(np.asarray(out_fused), np.asarray(ref),
                               rtol=3e-2, atol=3e-2)

    print("KERNEL_OK")
</pallas_src>

<mosaic_0001>
module attributes {stable_mosaic.version = 11 : i64} {
  func.func @_layernorm_kernel(%arg0: i32, %arg1: memref<8x128xf32, #tpu.memory_space<vmem>>, %arg2: memref<1x128xf32, #tpu.memory_space<vmem>>, %arg3: memref<1x128xf32, #tpu.memory_space<vmem>>, %arg4: memref<8x128xf32, #tpu.memory_space<vmem>>) attributes {dimension_semantics = [#tpu.dimension_semantics<parallel>], iteration_bounds = array<i64: 2>, scalar_prefetch = 0 : i64, scratch_operands = 0 : i64, tpu.core_type = #tpu.core_type<tc>, window_params = [{transform_indices = @transform_0, window_bounds = array<i64: 8, 128>}, {pipeline_mode = #tpu.pipeline_mode<synchronous>, transform_indices = @transform_1, window_bounds = array<i64: 1, 128>}, {pipeline_mode = #tpu.pipeline_mode<synchronous>, transform_indices = @transform_2, window_bounds = array<i64: 1, 128>}, {transform_indices = @transform_3, window_bounds = array<i64: 8, 128>}]} {
    %c0 = arith.constant 0 : index
    %c0_0 = arith.constant 0 : index
    %0 = vector.load %arg1[%c0, %c0_0] : memref<8x128xf32, #tpu.memory_space<vmem>>, vector<8x128xf32>
    %cst = arith.constant dense<0.000000e+00> : vector<8xf32>
    %1 = vector.multi_reduction <add>, %0, %cst [1] : vector<8x128xf32> to vector<8xf32>
    %2 = vector.shape_cast %1 : vector<8xf32> to vector<8x1xf32>
    %cst_1 = arith.constant 1.280000e+02 : f32
    %3 = vector.broadcast %cst_1 : f32 to vector<8x1xf32>
    %4 = arith.divf %2, %3 : vector<8x1xf32>
    %5 = vector.broadcast %4 : vector<8x1xf32> to vector<8x128xf32>
    %6 = arith.subf %0, %5 : vector<8x128xf32>
    %7 = arith.mulf %6, %6 : vector<8x128xf32>
    %cst_2 = arith.constant dense<0.000000e+00> : vector<8xf32>
    %8 = vector.multi_reduction <add>, %7, %cst_2 [1] : vector<8x128xf32> to vector<8xf32>
    %9 = vector.shape_cast %8 : vector<8xf32> to vector<8x1xf32>
    %cst_3 = arith.constant 0.00787401571 : f32
    %10 = vector.broadcast %cst_3 : f32 to vector<8x1xf32>
    %11 = arith.mulf %9, %10 : vector<8x1xf32>
    %12 = math.sqrt %11 : vector<8x1xf32>
    %cst_4 = arith.constant 9.99999997E-7 : f32
    %13 = vector.broadcast %cst_4 : f32 to vector<8x1xf32>
    %14 = arith.addf %12, %13 : vector<8x1xf32>
    %15 = tpu.reciprocal %14 : vector<8x1xf32> -> vector<8x1xf32>
    %c0_5 = arith.constant 0 : index
    %c0_6 = arith.constant 0 : index
    %16 = vector.load %arg2[%c0_5, %c0_6] : memref<1x128xf32, #tpu.memory_space<vmem>>, vector<1x128xf32>
    %17 = vector.broadcast %15 : vector<8x1xf32> to vector<8x128xf32>
    %18 = arith.mulf %6, %17 : vector<8x128xf32>
    %19 = vector.broadcast %16 : vector<1x128xf32> to vector<8x128xf32>
    %20 = arith.mulf %19, %18 : vector<8x128xf32>
    %c0_7 = arith.constant 0 : index
    %c0_8 = arith.constant 0 : index
    %21 = vector.load %arg3[%c0_7, %c0_8] : memref<1x128xf32, #tpu.memory_space<vmem>>, vector<1x128xf32>
    %22 = vector.broadcast %21 : vector<1x128xf32> to vector<8x128xf32>
    %23 = arith.addf %20, %22 : vector<8x128xf32>
    %c0_9 = arith.constant 0 : index
    %c0_10 = arith.constant 0 : index
    %24 = vector.load %arg4[%c0_9, %c0_10] : memref<8x128xf32, #tpu.memory_space<vmem>>, vector<8x128xf32>
    tpu.vector_store %arg4[%c0_9, %c0_10], %23 {strides = array<i32>} : memref<8x128xf32, #tpu.memory_space<vmem>>, vector<8x128xf32>,
    return
  }
  func.func @transform_0(%arg0: i32) -> (i32, i32) {
    %c0_i32 = arith.constant 0 : i32
    %c0_i32_0 = arith.constant 0 : i32
    return %arg0, %c0_i32 : i32, i32
  }
  func.func @transform_1(%arg0: i32) -> (i32, i32) {
    %c0_i32 = arith.constant 0 : i32
    %c0_i32_0 = arith.constant 0 : i32
    %c0_i32_1 = arith.constant 0 : i32
    return %c0_i32, %c0_i32_0 : i32, i32
  }
  func.func @transform_2(%arg0: i32) -> (i32, i32) {
    %c0_i32 = arith.constant 0 : i32
    %c0_i32_0 = arith.constant 0 : i32
    %c0_i32_1 = arith.constant 0 : i32
    return %c0_i32, %c0_i32_0 : i32, i32
  }
  func.func @transform_3(%arg0: i32) -> (i32, i32) {
    %c0_i32 = arith.constant 0 : i32
    %c0_i32_0 = arith.constant 0 : i32
    return %arg0, %c0_i32 : i32, i32
  }
}

</mosaic_0001>

<bundles_post_ra>
// kernel: _lambda_.1
= control target key start
LH: loop header
LB: loop body
LE: loop exit
PB: predicated region body
PF: predicated region fallthrough
CT: control target
= control target key end

     0   :  { %8 = vsyncpa [#allocation3], 0  ;;  %s534_s0 = inlined_call_operand.hbm [shape: f32[16,128], index: 0, kind: input, shape index: {}]   ;;  %s535_s1 = inlined_call_operand.vmem [shape: f32[1,128], index: 1, kind: input, shape index: {}]   ;;  %s536_s2 = inlined_call_operand.vmem [shape: f32[1,128], index: 2, kind: input, shape index: {}]   ;;  %s537_s3 = inlined_call_operand.vmem [shape: f32[16,128], index: 3, kind: output, shape index: {}]  }
   0x1   :  { %10 = vsyncpa [#allocation3 + $0x1], 0  ;;  %s428_s12 = smov 0   ;;  %s430_s13 = smov 0  }
   0x2   :  { %s432_s14 = smov 0   ;;  %s434_s15 = smov 0  }
   0x3 LB: > { %s447_s16 = sadd.s32 4294967295, %s405_s15   ;;  %s450_s17 = sadd.s32 1, %s405_s15   ;;  %s405_s15 = sphi %s434_s15, %s547_s15   ;;  %s401_s14 = sphi %s432_s14, %s546_s14   ;;  %s397_s13 = sphi %s430_s13, %s545_s13   ;;  %s393_s12 = sphi %s428_s12, %s544_s12  }
   0x4   : > { %s20_s18 = ssub.s32 %s405_s15, %s450_s17  ;;  %s23_s19 = sadd.s32 1, %s401_s14 }
   0x5   : > { %p21_p0 = scmp.eq.s32.totalorder %s20_s18, 0  ;;  %p30_p1 = scmp.ne.s32.totalorder %s401_s14, %s397_s13 }
   0x6   : > { %p31_p2 = scmp.eq.s32.totalorder %s405_s15, 0  ;;  %p36_p3 = scmp.ne.s32.totalorder %s397_s13, %s393_s12 }
   0x7   : > { %s460_s20 = scalar_select %p21_p0, %s401_s14, %s23_s19  }
   0x8   : > { %p32_p4 = por %p31_p2, %p30_p1  ;;  %p37_p5 = scmp.eq.s32.totalorder %s447_s16, 0 }
   0x9   : > { %p306_p6 = scmp.lt.s32.totalorder %s405_s15, 2  ;;  %s134_s22 = sand.u32 1, %s401_s14  }
   0xa   : > { %p464_p7 = por %p37_p5, %p36_p3  ;;  %s291_s23 = sshll.u32 %s134_s22, 3 }
   0xb   : > { %s292_s24 = sshll.u32 %s405_s15, 7  ;;  %s138_s28 = scalar_lea.vmem [#allocation2], %s291_s23 }
   0xc   : > { %s539_s21 = scalar_select %p464_p7, 1, 0 }
   0xd   : > { %s473_s27 = scalar_lea.hbm %s534_s0, %s292_s24  ;;  %s145_s29 = sshll.u32 %s138_s28, 4  ;;  %s475_s29 = int_to_ptr.vmem [resolvable:$true] %s145_s29 }
   0xe   : > { %p477_p8 = pnand %p306_p6, %p32_p4  ;;  %s135_s4 = scalar_lea.sflag [#allocation3], %s134_s22 }
   0xf   : > { %s343_s5 = scalar_lea.hbm %s473_s27, 128  ;;  %s348_s8 = scalar_lea.hbm %s534_s0, 256 }
  0x10   : > { %p344_p11 = scmp.ne.s32.totalorder %s473_s27, %s343_s5  ;;  %p345_p12 = pneg %p477_p8 }
  0x11   : > { %p349_p1 = scmp.lt.s32.totalorder %s473_s27, %s534_s0  ;;  %p350_p2 = scmp.lt.s32.totalorder %s348_s8, %s343_s5 }
  0x12   : > { %p346_p13 = pnand %p345_p12, %p344_p11 }
  0x13   : > { %p351_p3 = por %p350_p2, %p349_p1 }
  0x14   : > { %p347_p0 = pneg %p346_p13 }
  0x16   : > { %p352_p4 = pnand %p351_p3, %p347_p0 }
  0x18   : > { %355 = shalt.err (!%p352_p4)
}
  0x19   : > { %s356_s11 = scalar_lea.vmem %s475_s29, 128  ;;  %s407_s12 = smov [#allocation2]  }
  0x1a   : > { %p357_p5 = scmp.ne.s32.totalorder %s475_s29, %s356_s11  ;;  %s361_s18 = sshll.u32 %s407_s12, 4  ;;  %s362_s18 = int_to_ptr.vmem [resolvable:$false] %s361_s18 }
  0x1b   : > { %s363_s19 = scalar_lea.vmem %s362_s18, 256  ;;  %p364_p13 = scmp.lt.s32.totalorder %s475_s29, %s362_s18 }
  0x1c   : > { %p359_p6 = pnand %p357_p5, %p345_p12  ;;  %p365_p9 = scmp.lt.s32.totalorder %s363_s19, %s356_s11 }
  0x1e   : > { %p360_p11 = pneg %p359_p6  ;;  %p366_p10 = por %p365_p9, %p364_p13 }
  0x20   : > { %p367_p7 = pnand %p366_p10, %p360_p11 }
  0x22   : > { %370 = shalt.err (!%p367_p7)
}
  0x23   : > { %305 = dma.hbm_to_vmem [thread:$0]  (!%p477_p8), %s473_s27, 128, %s475_s29, %s135_s4  }
  0x24   : > { %p541_p0 = scmp.lt.s32.totalorder %s405_s15, 3  ;;  %p542_p1 = scmp.ge.s32.totalorder %s405_s15, 1 }
  0x26   : > { %p151_p12 = pnand %p542_p1, %p541_p0 }
  0x27   : > { %s156_s22 = sand.u32 (!%p151_p12), 1, %s397_s13   ;;  %p543_p9 = scmp.ne.s32.totalorder (!%p151_p12), %s539_s21, 0 }
  0x28   : > { %154 = sbr.rel (%p151_p12) target bundleno = 372 (0x174), region = 32  ;;  %s294_s23 = sshll.u32 (!%p151_p12), %s156_s22, 3 }
  0x29   : > { %s157_s24 = scalar_lea.sflag (!%p151_p12), [#allocation3], %s156_s22  ;;  %s160_s25 = scalar_lea.vmem (!%p151_p12), [#allocation2], %s294_s23 }
  0x2d   : > { %388 = dma.done.wait (%p543_p9), %s157_s24, 128  }
  0x2e   : > { %390 = vsyncadd (%p543_p9), %s157_s24, 4294967168  ;;  %v186_v0 = vld [vmem:[%s160_s25] sm:$0xff]  ;;  %p182_p7 = scmp.lt.s32.totalorder %s447_s16, 1 }
  0x2f   : > { %187 = vadd.xlane.f32.xlu0 %v186_v0  ;;  %v296_v14 = vld [vmem:[%s535_s1] ss:$0 sm:$0xff] }
  0x30   : > { %s549_s16 = smov (!%p182_p7, %s447_s16), 1  ;;  %v297_v16 = vld [vmem:[%s536_s2] ss:$0 sm:$0xff] }
  0x31   : > { %s295_s26 = sshll.u32 %s549_s16, 3 }
  0x32   : > { %s185_s4 = scalar_lea.vmem %s537_s3, %s295_s26 }
  0xb8   : > { %v188_v1 = vpop.xlane.xlu0 %187 }
  0xb9   : > { %v190_v2 = vmul.f32 0.0078125, %v188_v1 }
  0xbb   : > { %v191_v3 = vsub.f32 %v186_v0, %v190_v2 }
  0xbd   : > { %v192_v4 = vmul.f32 %v191_v3, %v191_v3 }
  0xbf   : > { %193 = vadd.xlane.f32.xlu0 %v192_v4 }
 0x148   : > { %v194_v5 = vpop.xlane.xlu0 %193 }
 0x149   : > { %v195_v6 = vmul.f32 0.007874016, %v194_v5 }
 0x14b   : > { %339 = vrsqrt.f32 %v195_v6  ;;  %vm198_vm0 = vcmp.eq.f32.partialorder %v195_v6, inf  ;;  %v201_v9 = vand.u32 2147483648, %v195_v6  ;;  %vm200_vm1 = vcmp.eq.f32.partialorder %v195_v6, 0.0 }
 0x158   : > { %v340_v7 = vpop.eup %339 }
 0x159   : > { %v197_v8 = vmul.f32 %v340_v7, %v195_v6 }
 0x15b   : > { %v199_v10 = vsel %vm198_vm0, %v195_v6, %v197_v8 }
 0x15c   : > { %v202_v11 = vsel %vm200_vm1, %v201_v9, %v199_v10 }
 0x15d   : > { %v203_v12 = vadd.f32 1e-06, %v202_v11 }
 0x15f   : > { %341 = vrcp.f32 %v203_v12 }
 0x16c   : > { %v342_v13 = vpop.eup %341 }
 0x16d   : > { %v206_v15 = vmul.f32 %v342_v13, %v191_v3 }
 0x16f   : > { %v213_v17 = vmul.f32 %v296_v14, %v206_v15 }
 0x171   : > { %v221_v18 = vadd.f32 %v297_v16, %v213_v17 }
 0x173   : > { %222 = vst [vmem:[%s185_s4] sm:$0xff] %v221_v18 }
 0x174 PF: > { %p13_p8 = scmp.ge.s32.totalorder %s450_s17, 4   ;;  %s544_s12 = smov %s397_s13 }
 0x175   : > { %s545_s13 = smov %s401_s14  ;;  %s546_s14 = smov %s460_s20 }
 0x176   : > { %s547_s15 = smov %s450_s17  ;;  %15 = sbr.rel (!%p13_p8) target bundleno = 3 (0x3), region = 72 }
 0x17b   :  { %242 = vsyncpa [#allocation3], 1 }
 0x17c   :  { %244 = vsyncpa [#allocation3 + $0x1], 1 }

</bundles_post_ra>
